<compile_context>
chip_gen: v7x
topology: tpu7x:2x2x1
jax: 0.10.0
libtpu: 0.0.40
codegen_flags: <defaults>
</compile_context>

<pallas_src>
import functools

import jax
import jax.numpy as jnp
import numpy as np
from jax import lax
from jax.experimental import pallas as pl
from jax.experimental.pallas import tpu as pltpu

EPS = 1e-6  # RMSNorm eps


def _rmsnorm(z, g):
    ms = jnp.mean(z * z, axis=-1, keepdims=True)
    return z * lax.rsqrt(ms + EPS) * g


def _map_block_kernel(
    x_ref,    # (B*N, D)   input tokens, flattened over (batch, token)
    vd_ref,   # (8, D)     packed D-wide vectors (see fold_params)
    vm_ref,   # (2, M)     packed M-wide vectors: [b_glu_value, b_glu_gate]
    w3_ref,   # (3, D, D)  [w_score (head-replicated), w_proj_v, w_attn_o]
    wg_ref,   # (2, D, M)  [w_glu_value, w_glu_gate]
    w2_ref,   # (M, D)     MLP output weight
    out_ref,  # (B, D)     output (n_latents == 1, already squeezed)
    *,
    B, N, D, M,
):
    vd = vd_ref[...]                       # (8, D) -- one small load
    lat    = vd[0:1]                       # latent seed (residual term)
    b_o    = vd[1:2]                       # folded attn output bias (incl. b_pv @ w_o)
    g_attn = vd[2:3]                       # attn RMSNorm gain
    b_mlp2 = vd[3:4]                       # MLP output bias
    g_mlp  = vd[4:5]                       # mlp RMSNorm gain

    x2 = x_ref[...]                        # (B*N, D) -- one big MXU operand

    # Fused (projection o kv o q*scale): head-replicated scores and projected
    # values in two MXU matmuls total.  No biases needed (see fold_params).
    s = jnp.dot(x2, w3_ref[0], preferred_element_type=jnp.float32).reshape(B, N, D)
    v = jnp.dot(x2, w3_ref[1], preferred_element_type=jnp.float32).reshape(B, N, D)

    # Lane-wise softmax over tokens (sublane axis).  Lanes within one head
    # hold identical scores, so this reproduces the per-head softmax exactly.
    s = s - jnp.max(s, axis=1, keepdims=True)
    p = jnp.exp(s)
    p = p * pl.reciprocal(jnp.sum(p, axis=1, keepdims=True), approx=True)

    # Weighted sum over tokens: broadcast multiply + sublane reduce (VPU/XLU).
    vals = jnp.sum(p * v, axis=1, keepdims=True).reshape(B, D)           # (B, D)
    attn_out = jnp.dot(vals, w3_ref[2], preferred_element_type=jnp.float32) + b_o

    # residual + post RMSNorm
    h1 = _rmsnorm(lat + attn_out, g_attn)                                # (B, D)

    # SwishGLU MLP (value / gate weights pre-split, no lane-axis split here)
    proj = jnp.dot(h1, wg_ref[0], preferred_element_type=jnp.float32) + vm_ref[0:1]
    gate = jnp.dot(h1, wg_ref[1], preferred_element_type=jnp.float32) + vm_ref[1:2]
    glu = proj * (gate * jax.nn.sigmoid(gate))                           # (B, M)
    mlp_out = jnp.dot(glu, w2_ref[...], preferred_element_type=jnp.float32) + b_mlp2

    # residual + post RMSNorm
    out_ref[...] = _rmsnorm(h1 + mlp_out, g_mlp)


def fold_params(latents, params, *, n_heads, scale):
    """One-time (trace-time) algebraic folding + packing of the parameters."""
    K, D = latents.shape
    # TODO(synk): n_latents > 1 not supported by the fused K==1 attention path.
    assert K == 1, "this kernel is specialized for n_latents == 1"
    H = n_heads
    Dh = D // H
    M = params["w_mlp2"].shape[0]

    w_k = params["w_kv"][:, :D]
    w_v = params["w_kv"][:, D:]
    # Fold the input projection into k / v.
    w_pk = params["w_proj"] @ w_k          # (D, D)
    w_pv = params["w_proj"] @ w_v          # (D, D)
    b_pv = params["b_proj"] @ w_v          # (1, D)
    # The k-side bias (b_proj @ w_k) only shifts scores by a per-lane constant
    # that is identical for every token -> it cancels in the softmax; drop it.

    # Fold q (= latents @ w_q) and the softmax scale into a per-head score
    # weight, then replicate each head's column Dh times along the lane axis.
    qvec = (latents @ params["w_q"]) * scale                 # (1, D)
    w_sc_h = (w_pk * qvec).reshape(D, H, Dh).sum(-1)         # (D, H)
    w_sc = jnp.repeat(w_sc_h, Dh, axis=1)                    # (D, D)

    # Softmax weights sum to 1 per (batch, lane), so the value bias b_pv
    # contributes exactly b_pv @ w_attn_o to the attention output; fold it
    # into the output-projection bias (removes a (B*N, D)-wide add).
    b_o = b_pv @ params["w_attn_o"] + params["b_attn_o"]     # (1, D)

    # Pack the small D-wide vectors into one (8, D) array.
    rows = jnp.stack([
        latents[0], b_o[0], params["g_attn"][0],
        params["b_mlp2"][0], params["g_mlp"][0],
    ])
    vec_d = jnp.zeros((8, D), jnp.float32).at[:5].set(rows)

    vec_m = jnp.stack([params["b_glu"][0, :M], params["b_glu"][0, M:]])   # (2, M)
    w3 = jnp.stack([w_sc, w_pv, params["w_attn_o"]])                      # (3, D, D)
    wg = jnp.stack([params["w_glu"][:, :M], params["w_glu"][:, M:]])      # (2, D, M)

    return {"vec_d": vec_d, "vec_m": vec_m, "w3": w3, "wg": wg,
            "w2": params["w_mlp2"]}


def map_block_forward(x, folded):
    """x: (B, N, D) float32 -> (B, D) float32 (n_latents == 1)."""
    B, N, D = x.shape
    M = folded["w2"].shape[0]

    # Flatten (batch, token) outside the kernel: free at the XLA level and
    # gives one big MXU operand inside.
    x2 = x.reshape(B * N, D)

    # Single kernel invocation: everything (a few KB of weights + the tiny
    # activation tensors) lives in VMEM; no grid, no pipelining overhead.
    # TODO(synk): for large B, block the batch into a "parallel" grid axis so
    # both v7x TensorCores get work; unnecessary at this size.
    vmem = pl.BlockSpec(memory_space=pltpu.MemorySpace.VMEM)
    out = pl.pallas_call(
        functools.partial(_map_block_kernel, B=B, N=N, D=D, M=M),
        out_shape=jax.ShapeDtypeStruct((B, D), jnp.float32),
        in_specs=[vmem] * 6,
        out_specs=vmem,
    )(x2, folded["vec_d"], folded["vec_m"], folded["w3"], folded["wg"], folded["w2"])
    return out


def _reference(x, latents, params, *, n_heads, scale):
    """Pure-JAX reference mirroring the PyTorch forward (un-folded weights)."""
    B, N, D = x.shape
    K = latents.shape[0]
    H = n_heads
    Dh = D // H
    M = params["w_mlp2"].shape[0]

    xp = x @ params["w_proj"] + params["b_proj"][0]
    lat = jnp.broadcast_to(latents[None], (B, K, D))

    q = lat @ params["w_q"]
    kv = xp @ params["w_kv"]
    k, v = kv[..., :D], kv[..., D:]
    qh = q.reshape(B, K, H, Dh).transpose(0, 2, 1, 3)
    kh = k.reshape(B, N, H, Dh).transpose(0, 2, 1, 3)
    vh = v.reshape(B, N, H, Dh).transpose(0, 2, 1, 3)
    s = jnp.einsum("bhkd,bhnd->bhkn", qh, kh) * scale
    a = jax.nn.softmax(s, axis=-1)
    vals = jnp.einsum("bhkn,bhnd->bhkd", a, vh).transpose(0, 2, 1, 3).reshape(B, K, D)
    attn_out = vals @ params["w_attn_o"] + params["b_attn_o"][0]

    h1 = _rmsnorm(lat + attn_out, params["g_attn"][0])

    pg = h1 @ params["w_glu"] + params["b_glu"][0]
    proj, gate = pg[..., :M], pg[..., M:]
    mlp_out = (proj * jax.nn.silu(gate)) @ params["w_mlp2"] + params["b_mlp2"][0]
    h2 = _rmsnorm(h1 + mlp_out, params["g_mlp"][0])
    return h2[:, 0, :] if K == 1 else h2


def init_params(key, D, M):
    """Deterministic synthetic init. Weights stored as (in, out) (torch Linear transposed)."""
    ks = jax.random.split(key, 8)
    n = lambda k, shape, fan_in: (jax.random.normal(k, shape, jnp.float32) / np.sqrt(fan_in))
    return {
        "w_proj":   n(ks[0], (D, D), D),
        "b_proj":   0.01 * jnp.ones((1, D), jnp.float32),
        "w_q":      n(ks[1], (D, D), D),
        "w_kv":     n(ks[2], (D, 2 * D), D),
        "w_attn_o": n(ks[3], (D, D), D),
        "b_attn_o": 0.01 * jnp.ones((1, D), jnp.float32),
        "g_attn":   jnp.ones((1, D), jnp.float32),
        "w_glu":    n(ks[4], (D, 2 * M), D),
        "b_glu":    0.01 * jnp.ones((1, 2 * M), jnp.float32),
        "w_mlp2":   n(ks[5], (M, D), M),
        "b_mlp2":   0.01 * jnp.ones((1, D), jnp.float32),
        "g_mlp":    jnp.ones((1, D), jnp.float32),
    }


if __name__ == "__main__":
    # MAPBlock(n_latents=1, embed_dim=32, n_heads=2, mlp_ratio=4.0)
    # => attention heads = 2 * n_heads = 4, head_dim = 8, mlp hidden M = 128.
    B, N, D = 2, 16, 32
    n_latents = 1
    n_heads_cfg = 2
    H = 2 * n_heads_cfg               # MAPAttention receives 2 * n_heads heads
    Dh = D // H
    scale = float(Dh) ** -0.5
    M = int(4.0 * D)

    key = jax.random.PRNGKey(0)
    kx, klat, kp = jax.random.split(key, 3)
    x = jax.random.normal(kx, (B, N, D), jnp.float32)
    latents = 0.02 * jax.random.normal(klat, (n_latents, D), jnp.float32)
    params = init_params(kp, D, M)

    # TODO(synk): optional attention_mask and init_embed paths not implemented
    # (mask=None, init_embed=None assumed, matching the default forward).
    folded = fold_params(latents, params, n_heads=H, scale=scale)
    out = map_block_forward(x, folded)
    out = jax.block_until_ready(out)
    assert out.shape == (B, D), out.shape

    ref = _reference(x, latents, params, n_heads=H, scale=scale)
    np.testing.assert_allclose(np.asarray(out), np.asarray(ref), rtol=5e-2, atol=5e-2)

    print("KERNEL_OK")
</pallas_src>

<mosaic_0001>
module attributes {stable_mosaic.version = 11 : i64} {
  func.func @_map_block_kernel(%arg0: memref<32x32xf32, #tpu.memory_space<vmem>>, %arg1: memref<8x32xf32, #tpu.memory_space<vmem>>, %arg2: memref<2x128xf32, #tpu.memory_space<vmem>>, %arg3: memref<3x32x32xf32, #tpu.memory_space<vmem>>, %arg4: memref<2x32x128xf32, #tpu.memory_space<vmem>>, %arg5: memref<128x32xf32, #tpu.memory_space<vmem>>, %arg6: memref<2x32xf32, #tpu.memory_space<vmem>>) attributes {dimension_semantics = [], scalar_prefetch = 0 : i64, scratch_operands = 0 : i64, tpu.core_type = #tpu.core_type<tc>} {
    %c0 = arith.constant 0 : index
    %c0_0 = arith.constant 0 : index
    %0 = vector.load %arg1[%c0, %c0_0] : memref<8x32xf32, #tpu.memory_space<vmem>>, vector<8x32xf32>
    %1 = vector.extract_strided_slice %0 {offsets = [0, 0], sizes = [1, 32], strides = [1, 1]} : vector<8x32xf32> to vector<1x32xf32>
    %2 = vector.extract_strided_slice %0 {offsets = [1, 0], sizes = [1, 32], strides = [1, 1]} : vector<8x32xf32> to vector<1x32xf32>
    %3 = vector.extract_strided_slice %0 {offsets = [2, 0], sizes = [1, 32], strides = [1, 1]} : vector<8x32xf32> to vector<1x32xf32>
    %4 = vector.extract_strided_slice %0 {offsets = [3, 0], sizes = [1, 32], strides = [1, 1]} : vector<8x32xf32> to vector<1x32xf32>
    %5 = vector.extract_strided_slice %0 {offsets = [4, 0], sizes = [1, 32], strides = [1, 1]} : vector<8x32xf32> to vector<1x32xf32>
    %c0_1 = arith.constant 0 : index
    %c0_2 = arith.constant 0 : index
    %6 = vector.load %arg0[%c0_1, %c0_2] : memref<32x32xf32, #tpu.memory_space<vmem>>, vector<32x32xf32>
    %c0_3 = arith.constant 0 : index
    %c0_4 = arith.constant 0 : index
    %c0_5 = arith.constant 0 : index
    %7 = vector.load %arg3[%c0_3, %c0_4, %c0_5] : memref<3x32x32xf32, #tpu.memory_space<vmem>>, vector<1x32x32xf32>
    %8 = vector.shape_cast %7 : vector<1x32x32xf32> to vector<32x32xf32>
    %cst = arith.constant dense<0.000000e+00> : vector<32x32xf32>
    %9 = tpu.matmul %6, %8, %cst {dimension_numbers = #tpu.dot_dimension_numbers<[1], [0], [0], [1], [0, 0, 1, 1], [], []>} : vector<32x32xf32>, vector<32x32xf32>, vector<32x32xf32> -> vector<32x32xf32>
    %10 = vector.shape_cast %9 : vector<32x32xf32> to vector<2x16x32xf32>
    %c1 = arith.constant 1 : index
    %c0_6 = arith.constant 0 : index
    %c0_7 = arith.constant 0 : index
    %11 = vector.load %arg3[%c1, %c0_6, %c0_7] : memref<3x32x32xf32, #tpu.memory_space<vmem>>, vector<1x32x32xf32>
    %12 = vector.shape_cast %11 : vector<1x32x32xf32> to vector<32x32xf32>
    %cst_8 = arith.constant dense<0.000000e+00> : vector<32x32xf32>
    %13 = tpu.matmul %6, %12, %cst_8 {dimension_numbers = #tpu.dot_dimension_numbers<[1], [0], [0], [1], [0, 0, 1, 1], [], []>} : vector<32x32xf32>, vector<32x32xf32>, vector<32x32xf32> -> vector<32x32xf32>
    %14 = vector.shape_cast %13 : vector<32x32xf32> to vector<2x16x32xf32>
    %cst_9 = arith.constant dense<0xFF800000> : vector<2x32xf32>
    %15 = vector.multi_reduction <maximumf>, %10, %cst_9 [1] : vector<2x16x32xf32> to vector<2x32xf32>
    %16 = vector.shape_cast %15 : vector<2x32xf32> to vector<2x1x32xf32>
    %17 = vector.broadcast %16 : vector<2x1x32xf32> to vector<2x16x32xf32>
    %18 = arith.subf %10, %17 : vector<2x16x32xf32>
    %19 = math.exp %18 : vector<2x16x32xf32>
    %cst_10 = arith.constant dense<0.000000e+00> : vector<2x32xf32>
    %20 = vector.multi_reduction <add>, %19, %cst_10 [1] : vector<2x16x32xf32> to vector<2x32xf32>
    %21 = vector.shape_cast %20 : vector<2x32xf32> to vector<2x1x32xf32>
    %22 = tpu.reciprocal %21 {approx = true} : vector<2x1x32xf32> -> vector<2x1x32xf32>
    %23 = vector.broadcast %22 : vector<2x1x32xf32> to vector<2x16x32xf32>
    %24 = arith.mulf %19, %23 : vector<2x16x32xf32>
    %25 = arith.mulf %24, %14 : vector<2x16x32xf32>
    %cst_11 = arith.constant dense<0.000000e+00> : vector<2x32xf32>
    %26 = vector.multi_reduction <add>, %25, %cst_11 [1] : vector<2x16x32xf32> to vector<2x32xf32>
    %27 = vector.shape_cast %26 : vector<2x32xf32> to vector<2x1x32xf32>
    %28 = vector.shape_cast %27 : vector<2x1x32xf32> to vector<2x32xf32>
    %c2 = arith.constant 2 : index
    %c0_12 = arith.constant 0 : index
    %c0_13 = arith.constant 0 : index
    %29 = vector.load %arg3[%c2, %c0_12, %c0_13] : memref<3x32x32xf32, #tpu.memory_space<vmem>>, vector<1x32x32xf32>
    %30 = vector.shape_cast %29 : vector<1x32x32xf32> to vector<32x32xf32>
    %cst_14 = arith.constant dense<0.000000e+00> : vector<2x32xf32>
    %31 = tpu.matmul %28, %30, %cst_14 {dimension_numbers = #tpu.dot_dimension_numbers<[1], [0], [0], [1], [0, 0, 1, 1], [], []>} : vector<2x32xf32>, vector<32x32xf32>, vector<2x32xf32> -> vector<2x32xf32>
    %32 = vector.broadcast %2 : vector<1x32xf32> to vector<2x32xf32>
    %33 = arith.addf %31, %32 : vector<2x32xf32>
    %34 = vector.broadcast %1 : vector<1x32xf32> to vector<2x32xf32>
    %35 = arith.addf %34, %33 : vector<2x32xf32>
    %36 = arith.mulf %35, %35 : vector<2x32xf32>
    %cst_15 = arith.constant dense<0.000000e+00> : vector<2xf32>
    %37 = vector.multi_reduction <add>, %36, %cst_15 [1] : vector<2x32xf32> to vector<2xf32>
    %38 = vector.shape_cast %37 : vector<2xf32> to vector<2x1xf32>
    %cst_16 = arith.constant 3.200000e+01 : f32
    %39 = vector.broadcast %cst_16 : f32 to vector<2x1xf32>
    %40 = arith.divf %38, %39 : vector<2x1xf32>
    %cst_17 = arith.constant 9.99999997E-7 : f32
    %41 = vector.broadcast %cst_17 : f32 to vector<2x1xf32>
    %42 = arith.addf %40, %41 : vector<2x1xf32>
    %43 = math.rsqrt %42 : vector<2x1xf32>
    %44 = vector.broadcast %43 : vector<2x1xf32> to vector<2x32xf32>
    %45 = arith.mulf %35, %44 : vector<2x32xf32>
    %46 = vector.broadcast %3 : vector<1x32xf32> to vector<2x32xf32>
    %47 = arith.mulf %45, %46 : vector<2x32xf32>
    %c0_18 = arith.constant 0 : index
    %c0_19 = arith.constant 0 : index
    %c0_20 = arith.constant 0 : index
    %48 = vector.load %arg4[%c0_18, %c0_19, %c0_20] : memref<2x32x128xf32, #tpu.memory_space<vmem>>, vector<1x32x128xf32>
    %49 = vector.shape_cast %48 : vector<1x32x128xf32> to vector<32x128xf32>
    %cst_21 = arith.constant dense<0.000000e+00> : vector<2x128xf32>
    %50 = tpu.matmul %47, %49, %cst_21 {dimension_numbers = #tpu.dot_dimension_numbers<[1], [0], [0], [1], [0, 0, 1, 1], [], []>} : vector<2x32xf32>, vector<32x128xf32>, vector<2x128xf32> -> vector<2x128xf32>
    %c0_22 = arith.constant 0 : index
    %c0_23 = arith.constant 0 : index
    %51 = vector.load %arg2[%c0_22, %c0_23] : memref<2x128xf32, #tpu.memory_space<vmem>>, vector<1x128xf32>
    %52 = vector.broadcast %51 : vector<1x128xf32> to vector<2x128xf32>
    %53 = arith.addf %50, %52 : vector<2x128xf32>
    %c1_24 = arith.constant 1 : index
    %c0_25 = arith.constant 0 : index
    %c0_26 = arith.constant 0 : index
    %54 = vector.load %arg4[%c1_24, %c0_25, %c0_26] : memref<2x32x128xf32, #tpu.memory_space<vmem>>, vector<1x32x128xf32>
    %55 = vector.shape_cast %54 : vector<1x32x128xf32> to vector<32x128xf32>
    %cst_27 = arith.constant dense<0.000000e+00> : vector<2x128xf32>
    %56 = tpu.matmul %47, %55, %cst_27 {dimension_numbers = #tpu.dot_dimension_numbers<[1], [0], [0], [1], [0, 0, 1, 1], [], []>} : vector<2x32xf32>, vector<32x128xf32>, vector<2x128xf32> -> vector<2x128xf32>
    %c1_28 = arith.constant 1 : index
    %c0_29 = arith.constant 0 : index
    %57 = vector.load %arg2[%c1_28, %c0_29] : memref<2x128xf32, #tpu.memory_space<vmem>>, vector<1x128xf32>
    %58 = vector.broadcast %57 : vector<1x128xf32> to vector<2x128xf32>
    %59 = arith.addf %56, %58 : vector<2x128xf32>
    %60 = arith.negf %59 : vector<2x128xf32>
    %61 = math.exp %60 : vector<2x128xf32>
    %cst_30 = arith.constant 1.000000e+00 : f32
    %62 = vector.broadcast %cst_30 : f32 to vector<2x128xf32>
    %63 = arith.addf %62, %61 : vector<2x128xf32>
    %64 = arith.divf %62, %63 : vector<2x128xf32>
    %65 = arith.mulf %59, %64 : vector<2x128xf32>
    %66 = arith.mulf %53, %65 : vector<2x128xf32>
    %c0_31 = arith.constant 0 : index
    %c0_32 = arith.constant 0 : index
    %67 = vector.load %arg5[%c0_31, %c0_32] : memref<128x32xf32, #tpu.memory_space<vmem>>, vector<128x32xf32>
    %cst_33 = arith.constant dense<0.000000e+00> : vector<2x32xf32>
    %68 = tpu.matmul %66, %67, %cst_33 {dimension_numbers = #tpu.dot_dimension_numbers<[1], [0], [0], [1], [0, 0, 1, 1], [], []>} : vector<2x128xf32>, vector<128x32xf32>, vector<2x32xf32> -> vector<2x32xf32>
    %69 = vector.broadcast %4 : vector<1x32xf32> to vector<2x32xf32>
    %70 = arith.addf %68, %69 : vector<2x32xf32>
    %71 = arith.addf %47, %70 : vector<2x32xf32>
    %72 = arith.mulf %71, %71 : vector<2x32xf32>
    %cst_34 = arith.constant dense<0.000000e+00> : vector<2xf32>
    %73 = vector.multi_reduction <add>, %72, %cst_34 [1] : vector<2x32xf32> to vector<2xf32>
    %74 = vector.shape_cast %73 : vector<2xf32> to vector<2x1xf32>
    %cst_35 = arith.constant 3.200000e+01 : f32
    %75 = vector.broadcast %cst_35 : f32 to vector<2x1xf32>
    %76 = arith.divf %74, %75 : vector<2x1xf32>
    %cst_36 = arith.constant 9.99999997E-7 : f32
    %77 = vector.broadcast %cst_36 : f32 to vector<2x1xf32>
    %78 = arith.addf %76, %77 : vector<2x1xf32>
    %79 = math.rsqrt %78 : vector<2x1xf32>
    %80 = vector.broadcast %79 : vector<2x1xf32> to vector<2x32xf32>
    %81 = arith.mulf %71, %80 : vector<2x32xf32>
    %82 = vector.broadcast %5 : vector<1x32xf32> to vector<2x32xf32>
    %83 = arith.mulf %81, %82 : vector<2x32xf32>
    %c0_37 = arith.constant 0 : index
    %c0_38 = arith.constant 0 : index
    %84 = vector.load %arg6[%c0_37, %c0_38] : memref<2x32xf32, #tpu.memory_space<vmem>>, vector<2x32xf32>
    tpu.vector_store %arg6[%c0_37, %c0_38], %83 {strides = array<i32>} : memref<2x32xf32, #tpu.memory_space<vmem>>, vector<2x32xf32>,
    return
  }
}

</mosaic_0001>

<bundles_post_ra>
// kernel: tpu_custom_call.1
= control target key start
LH: loop header
LB: loop body
LE: loop exit
PB: predicated region body
PF: predicated region fallthrough
CT: control target
= control target key end

     0   :  { %11 = vsyncpa [#allocation3], 0  ;;  %s1259_s0 = inlined_call_operand.hbm [shape: f32[32,32], index: 0, kind: input, shape index: {}]   ;;  %s1260_s1 = inlined_call_operand.vmem [shape: f32[8,32], index: 1, kind: input, shape index: {}]   ;;  %s1261_s2 = inlined_call_operand.vmem [shape: f32[2,128], index: 2, kind: input, shape index: {}]   ;;  %s1262_s3 = inlined_call_operand.vmem [shape: f32[3,32,32], index: 3, kind: input, shape index: {}]   ;;  %s1263_s4 = inlined_call_operand.vmem [shape: f32[2,32,128], index: 4, kind: input, shape index: {}]   ;;  %s1264_s5 = inlined_call_operand.vmem [shape: f32[128,32], index: 5, kind: input, shape index: {}]   ;;  %s1265_s6 = inlined_call_operand.hbm [shape: f32[2,32], index: 6, kind: output, shape index: {}]  }
   0x1   :  { %12 = vsyncpa [#allocation4], 0  ;;  %s1009_s21 = smov [#allocation2]   ;;  %s961_s25 = scalar_lea.hbm %s1259_s0, 512 }
   0x2   :  { %s18_s22 = sshll.u32 %s1009_s21, 4  ;;  %p962_p0 = scmp.ne.s32.totalorder %s1259_s0, %s961_s25  ;;  %s19_s22 = int_to_ptr.vmem [resolvable:$true] %s18_s22 }
   0x3   :  { %p965_p1 = scmp.lt.u32.totalorder %s961_s25, %s1259_s0 }
   0x5   :  { %p967_p2 = pnand %p965_p1, %p962_p0 }
   0x7   :  { %970 = shalt.err (!%p967_p2)
}
   0x8   :  { %s971_s30 = scalar_lea.vmem %s19_s22, 512  ;;  %p976_p4 = scmp.lt.s32.totalorder %s19_s22, %s19_s22 }
   0x9   :  { %p972_p3 = scmp.ne.s32.totalorder %s19_s22, %s971_s30  ;;  %p977_p5 = scmp.lt.s32.totalorder %s971_s30, %s971_s30 }
   0xb   :  { %p978_p6 = por %p977_p5, %p976_p4 }
   0xd   :  { %p979_p7 = pnand %p978_p6, %p972_p3 }
   0xf   :  { %982 = shalt.err (!%p979_p7)
}
  0x10   :  { %s1010_s7 = smov 128   ;;  %s1011_s8 = smov 8  }
  0x11   :  { %24 = dma.hbm_to_vmem [thread:$0]  %s1259_s0, 512, %s19_s22, [#allocation3], %s1010_s7, %s1010_s7, %s1011_s8  }
  0x12   :  { %1005 = dma.done.wait [#allocation3], 512  }
  0x13   :  { %1006 = vsyncadd [#allocation3], 4294966784  ;;  %vm47_vm0 = vcmask 261120   ;;  %v43_v0 = vld [vmem:[%s1262_s3] sm:$0xff]  ;;  %v44_v1 = vld [vmem:[%s1262_s3 + $0x8] sm:$0xff]  ;;  %v1012_v19 = vmov 0.0|0.0  }
  0x14   :  { %v45_v2 = vld [vmem:[%s1262_s3 + $0x10] sm:$0xff]  ;;  %v876_v3 = vpack.c.bf16 %v44_v1, %v43_v0  ;;  %v46_v4 = vld [vmem:[%s1262_s3 + $0x18] sm:$0xff]  ;;  %v39_v5 = vld [vmem:[#allocation2] sm:$0xff]  ;;  %898 = vmatprep.subr.bf16.mxu1 %v1012_v19  ;;  %vm1013_vm1 = vmmov 0   ;;  %v1014_v23 = vmov 0.0   ;;  %vm322_vm2 = vcmask 1041409  }
  0x15   :  { %v880_v6 = vpack.c.bf16 %v46_v4, %v45_v2  ;;  %788 = vmatprep.mubr.msk.f32.mxu0 %vm47_vm0, %v39_v5  ;;  %v710_v7 = vld [vmem:[%s1262_s3 + $0x20] sm:$0xff]  ;;  %v711_v8 = vld [vmem:[%s1262_s3 + $0x28] sm:$0xff]  ;;  %v712_v10 = vld [vmem:[%s1262_s3 + $0x30] sm:$0xff]  ;;  %827 = vmatprep.mubr.msk.f32.mxu1 %vm1013_vm1, %v1014_v23  ;;  %vm402_vm3 = vcmask 254976  }
  0x16   :  { %877 = vmatprep.subr.bf16.mxu0 %v876_v3  ;;  %v884_v9 = vpack.c.bf16 %v711_v8, %v710_v7  ;;  %v713_v11 = vld [vmem:[%s1262_s3 + $0x38] sm:$0xff]  ;;  %v40_v12 = vld [vmem:[#allocation2 + $0x8] sm:$0xff]  ;;  %v41_v13 = vld [vmem:[#allocation2 + $0x10] sm:$0xff] }
  0x17   :  { %879 = vmatpush3.bf16.msra.mxu0 %v876_v3  ;;  %v888_v14 = vpack.c.bf16 %v713_v11, %v712_v10  ;;  %v42_v15 = vld [vmem:[#allocation2 + $0x18] sm:$0xff]  ;;  %v718_v16 = vld [vmem:[%s1262_s3 + $0x40] sm:$0xff]  ;;  %v719_v17 = vld [vmem:[%s1262_s3 + $0x48] sm:$0xff] }
  0x18   :  { %881 = vmatprep.subr.bf16.mxu0 %v880_v6  ;;  %v893_v18 = vpack.c.bf16 %v719_v17, %v718_v16  ;;  %v720_v20 = vld [vmem:[%s1262_s3 + $0x50] sm:$0xff]  ;;  %v721_v21 = vld [vmem:[%s1262_s3 + $0x58] sm:$0xff] }
  0x19   :  { %v896_v22 = vpack.c.bf16 %v721_v21, %v720_v20 }
  0x1b   :  { %883 = vmatpush3.bf16.msra.mxu0 %v880_v6 }
  0x1c   :  { %885 = vmatprep.subr.bf16.mxu0 %v884_v9 }
  0x1e   :  { %789 = vmatmul.mubr.msk.f32.vlgmr.msra.gmra.mrb[0].mxu0 %vm47_vm0, %v40_v12 }
  0x1f   :  { %791 = vmatprep.mubr.msk.f32.mxu0 %vm47_vm0, %v41_v13  ;;  %887 = vmatpush3.bf16.msra.mxu0 %v884_v9 }
  0x20   :  { %889 = vmatprep.subr.bf16.mxu0 %v888_v14 }
  0x22   :  { %792 = vmatmul.mubr.msk.f32.gmra.mrb[2].mxu0 %vm47_vm0, %v42_v15 }
  0x23   :  { %891 = vmatpush3.bf16.msra.mxu0 %v888_v14  ;;  %802 = vmatprep.mubr.msk.f32.mxu0 %vm47_vm0, %v39_v5 }
  0x24   :  { %892 = vmatprep.subr.bf16.mxu0 %v1012_v19 }
  0x26   :  { %803 = vmatmul.mubr.msk.f32.vlgmr.msra.gmra.mrb[4].mxu0 %vm47_vm0, %v40_v12 }
  0x27   :  { %805 = vmatprep.mubr.msk.f32.mxu0 %vm47_vm0, %v41_v13  ;;  %894 = vmatpush3.bf16.msra.mxu0 %v893_v18 }
  0x28   :  { %895 = vmatprep.subr.bf16.mxu0 %v1012_v19 }
  0x2a   :  { %806 = vmatmul.mubr.msk.f32.gmra.mrb[6].mxu0 %vm47_vm0, %v42_v15 }
  0x2b   :  { %897 = vmatpush3.bf16.msra.mxu0 %v896_v22  ;;  %816 = vmatprep.mubr.msk.f32.mxu0 %vm1013_vm1, %v1014_v23 }
  0x2c   :  { %904 = vmatprep.subr.bf16.mxu0 %v1012_v19 }
  0xf1   :  { %v790_v24 = vpop.f32.mrb[0].mxu0 }
  0xf2   :  { %v236_v25 = vsel %vm47_vm0, %v790_v24, -inf  ;;  %v126_v26 = vpop.f32.mrb[1].mxu0 }
  0xf3   :  { %v235_v27 = vsel %vm47_vm0, %v126_v26, -inf }
  0xf4   :  { %v237_v28 = vmax.f32 %v235_v27, %v236_v25 }
  0xf5   :  { %v793_v29 = vpop.f32.mrb[2].mxu0 }
  0xf6   :  { %v238_v30 = vrot.slane %v237_v28, 4  ;;  %v245_v31 = vsel %vm47_vm0, %v793_v29, -inf  ;;  %v136_v32 = vpop.f32.mrb[3].mxu0 }
  0xf7   :  { %v244_v33 = vsel %vm47_vm0, %v136_v32, -inf }
  0xf8   :  { %v239_v34 = vmax.f32 %v237_v28, %v238_v30  ;;  %v246_v35 = vmax.f32 %v244_v33, %v245_v31 }
  0xf9   :  { %v804_v36 = vpop.f32.mrb[4].mxu0 }
  0xfa   :  { %v240_v37 = vrot.slane %v239_v34, 2  ;;  %v247_v38 = vrot.slane %v246_v35, 4  ;;  %v216_v39 = vpop.f32.mrb[5].mxu0 }
  0xfc   :  { %v241_v40 = vmax.f32 %v239_v34, %v240_v37  ;;  %v248_v41 = vmax.f32 %v246_v35, %v247_v38 }
  0xfd   :  { %v807_v42 = vpop.f32.mrb[6].mxu0 }
  0xfe   :  { %v242_v43 = vrot.slane %v241_v40, 1  ;;  %v249_v44 = vrot.slane %v248_v41, 2  ;;  %v226_v45 = vpop.f32.mrb[7].mxu0 }
 0x100   :  { %v243_v46 = vmax.f32 %v241_v40, %v242_v43  ;;  %v250_v47 = vmax.f32 %v248_v41, %v249_v44 }
 0x102   :  { %v253_v48 = vsub.f32 %v126_v26, %v243_v46  ;;  %v254_v49 = vsub.f32 %v790_v24, %v243_v46  ;;  %v251_v50 = vrot.slane %v250_v47, 1 }
 0x104   :  { %v257_v51 = vmul.f32 1.442695, %v253_v48  ;;  %v259_v52 = vmul.f32 1.442695, %v254_v49  ;;  %v252_v53 = vmax.f32 %v250_v47, %v251_v50  ;;  %v1136_v50 = vld [vmem:[%s1260_s1] sm:$0xff] }
 0x106   :  { %941 = vpow2.f32 %v257_v51  ;;  %v255_v54 = vsub.f32 %v136_v32, %v252_v53  ;;  %v256_v55 = vsub.f32 %v793_v29, %v252_v53 }
 0x107   :  { %943 = vpow2.f32 %v259_v52 }
 0x108   :  { %v261_v56 = vmul.f32 1.442695, %v255_v54  ;;  %v263_v57 = vmul.f32 1.442695, %v256_v55 }
 0x10a   :  { %945 = vpow2.f32 %v261_v56 }
 0x10b   :  { %947 = vpow2.f32 %v263_v57 }
 0x110   :  { %v942_v58 = vpop.eup %941 }
 0x111   :  { %v944_v59 = vpop.eup %943  ;;  %v265_v60 = vsel %vm47_vm0, %v942_v58, 0.0 }
 0x112   :  { %v266_v61 = vsel %vm47_vm0, %v944_v59, 0.0 }
 0x113   :  { %v267_v62 = vadd.f32 %v266_v61, %v265_v60  ;;  %v416_v60 = vld [vmem:[%s1263_s4] sm:$0xff]  ;;  %v417_v61 = vld [vmem:[%s1263_s4 + $0x8] sm:$0xff] }
 0x114   :  { %v946_v63 = vpop.eup %945 }
 0x115   :  { %v948_v0 = vpop.eup %947  ;;  %v268_v1 = vrot.slane %v267_v62, 4  ;;  %v274_v2 = vsel %vm47_vm0, %v946_v63, 0.0 }
 0x116   :  { %v275_v3 = vsel %vm47_vm0, %v948_v0, 0.0 }
 0x117   :  { %v269_v4 = vadd.f32 %v268_v1, %v267_v62  ;;  %v276_v5 = vadd.f32 %v275_v3, %v274_v2  ;;  %v725_v62 = vld [vmem:[%s1263_s4 + $0x20] sm:$0xff]  ;;  %v418_v1 = vld [vmem:[%s1263_s4 + $0x10] sm:$0xff]  ;;  %v419_v2 = vld [vmem:[%s1263_s4 + $0x18] sm:$0xff] }
 0x119   :  { %v277_v6 = vrot.slane %v276_v5, 4  ;;  %v270_v7 = vrot.slane %v269_v4, 2 }
 0x11b   :  { %v278_v8 = vadd.f32 %v277_v6, %v276_v5  ;;  %v271_v9 = vadd.f32 %v270_v7, %v269_v4  ;;  %v727_v4 = vld [vmem:[%s1263_s4 + $0x30] sm:$0xff]  ;;  %v728_v5 = vld [vmem:[%s1263_s4 + $0x38] sm:$0xff]  ;;  %v902_v6 = vpack.c.bf16 %v419_v2, %v418_v1 }
 0x11c   :  { %v908_v7 = vpack.c.bf16 %v728_v5, %v727_v4 }
 0x11d   :  { %v272_v10 = vrot.slane %v271_v9, 1  ;;  %v279_v11 = vrot.slane %v278_v8, 2 }
 0x11f   :  { %v273_v12 = vadd.f32 %v272_v10, %v271_v9  ;;  %v280_v13 = vadd.f32 %v279_v11, %v278_v8 }
 0x121   :  { %949 = vrcp.f32 %v273_v12  ;;  %v281_v14 = vrot.slane %v280_v13, 1 }
 0x123   :  { %v282_v15 = vadd.f32 %v281_v14, %v280_v13 }
 0x125   :  { %951 = vrcp.f32 %v282_v15 }
 0x12b   :  { %v950_v16 = vpop.eup %949 }
 0x12c   :  { %v286_v17 = vmul.f32 %v950_v16, %v944_v59  ;;  %v285_v18 = vmul.f32 %v950_v16, %v942_v58  ;;  %v586_v16 = vld [vmem:[%s1264_s5] sm:$0xff] }
 0x12e   :  { %v290_v20 = vmul.f32 %v804_v36, %v286_v17  ;;  %v289_v21 = vmul.f32 %v285_v18, %v216_v39  ;;  %v587_v17 = vld [vmem:[%s1264_s5 + $0x8] sm:$0xff] }
 0x12f   :  { %v952_v22 = vpop.eup %951  ;;  %v911_v18 = vpack.c.bf16 %v587_v17, %v586_v16 }
 0x130   :  { %v294_v24 = vsel %vm47_vm0, %v290_v20, 0.0  ;;  %v293_v25 = vsel %vm47_vm0, %v289_v21, 0.0  ;;  %v288_v26 = vmul.f32 %v952_v22, %v948_v0  ;;  %v287_v27 = vmul.f32 %v952_v22, %v946_v63  ;;  %v726_v0 = vld [vmem:[%s1263_s4 + $0x28] sm:$0xff]  ;;  %v588_v20 = vld [vmem:[%s1264_s5 + $0x10] sm:$0xff]  ;;  %v590_v22 = vld [vmem:[%s1264_s5 + $0x20] sm:$0xff] }
 0x131   :  { %v295_v28 = vadd.f32 %v294_v24, %v293_v25  ;;  %v899_v63 = vpack.c.bf16 %v417_v61, %v416_v60  ;;  %v905_v3 = vpack.c.bf16 %v726_v0, %v725_v62  ;;  %v591_v24 = vld [vmem:[%s1264_s5 + $0x28] sm:$0xff] }
 0x132   :  { %v292_v29 = vmul.f32 %v807_v42, %v288_v26  ;;  %v291_v30 = vmul.f32 %v287_v27, %v226_v45  ;;  %v316_v45 = vlaneseq  ;;  %v917_v25 = vpack.c.bf16 %v591_v24, %v590_v22  ;;  %v592_v26 = vld [vmem:[%s1264_s5 + $0x30] sm:$0xff]  ;;  %v593_v27 = vld [vmem:[%s1264_s5 + $0x38] sm:$0xff] }
 0x133   :  { %v296_v31 = vrot.slane %v295_v28, 4  ;;  %900 = vmatpush3.bf16.msra.mxu1 %v899_v63 }
 0x134   :  { %v303_v32 = vsel %vm47_vm0, %v292_v29, 0.0  ;;  %v302_v33 = vsel %vm47_vm0, %v291_v30, 0.0  ;;  %v1130_v48 = vshrl.u32 %v316_v45, 7  ;;  %901 = vmatprep.subr.bf16.mxu1 %v1012_v19  ;;  %v594_v29 = vld [vmem:[%s1264_s5 + $0x40] sm:$0xff]  ;;  %v595_v30 = vld [vmem:[%s1264_s5 + $0x48] sm:$0xff] }
 0x135   :  { %v297_v34 = vadd.f32 %v296_v31, %v295_v28  ;;  %v304_v35 = vadd.f32 %v303_v32, %v302_v33  ;;  %v920_v28 = vpack.c.bf16 %v593_v27, %v592_v26  ;;  %v923_v31 = vpack.c.bf16 %v595_v30, %v594_v29  ;;  %v596_v32 = vld [vmem:[%s1264_s5 + $0x50] sm:$0xff]  ;;  %v597_v33 = vld [vmem:[%s1264_s5 + $0x58] sm:$0xff] }
 0x136   :  { %v318_v49 = vsub.s32 1, %v1130_v48  ;;  %v398_v51 = vsub.s32 0, %v1130_v48  ;;  %v413_v11 = vsub.s32 2, %v1130_v48 }
 0x137   :  { %v298_v37 = vrot.slane %v297_v34, 2  ;;  %v305_v36 = vrot.slane %v304_v35, 4  ;;  %903 = vmatpush3.bf16.msra.mxu1 %v902_v6 }
 0x138   :  { %v319_v52 = vrot.slane %v1136_v50, %v318_v49  ;;  %v399_v53 = vrot.slane %v1136_v50, %v398_v51  ;;  %910 = vmatprep.subr.bf16.mxu1 %v1012_v19  ;;  %v414_v12 = vrot.slane %v1136_v50, %v413_v11  ;;  %v723_v51 = vld [vmem:[%s1261_s2] ss:$0 sm:$0xff] }
 0x139   :  { %v299_v38 = vadd.f32 %v298_v37, %v297_v34  ;;  %v306_v39 = vadd.f32 %v305_v36, %v304_v35  ;;  %v926_v34 = vpack.c.bf16 %v597_v33, %v596_v32  ;;  %v598_v35 = vld [vmem:[%s1264_s5 + $0x60] sm:$0xff]  ;;  %v599_v37 = vld [vmem:[%s1264_s5 + $0x68] sm:$0xff] }
 0x13a   :  { %v929_v36 = vpack.c.bf16 %v599_v37, %v598_v35 }
 0x13b   :  { %v307_v40 = vrot.slane %v306_v39, 2  ;;  %v300_v41 = vrot.slane %v299_v38, 1 }
 0x13d   :  { %v308_v43 = vadd.f32 %v307_v40, %v306_v39  ;;  %v301_v46 = vadd.f32 %v300_v41, %v299_v38  ;;  %v600_v38 = vld [vmem:[%s1264_s5 + $0x70] sm:$0xff]  ;;  %v601_v39 = vld [vmem:[%s1264_s5 + $0x78] sm:$0xff]  ;;  %v729_v41 = vld [vmem:[%s1261_s2 + $0x1] ss:$0 sm:$0xff]  ;;  %s1015_s2 = smov [#allocation5]  }
 0x13e   :  { %v932_v40 = vpack.c.bf16 %v601_v39, %v600_v38 }
 0x13f   :  { %v309_v44 = vrot.slane %v308_v43, 1 }
 0x141   :  { %v310_v47 = vadd.f32 %v309_v44, %v308_v43 }
 0x143   :  { %v323_v42 = vsel %vm322_vm2, %v310_v47, %v301_v46 }
 0x144   :  { %817 = vmatmul.mubr.msk.f32.vlgmr.msra.gmra.mrb[8].mxu0 %vm47_vm0, %v323_v42 }
 0x145   :  { %838 = vmatprep.mubr.msk.f32.mxu0 %vm1013_vm1, %v1014_v23  ;;  %906 = vmatpush3.bf16.msra.mxu0 %v905_v3  ;;  %v687_v3 = vsub.s32 4, %v1130_v48 }
 0x146   :  { %907 = vmatprep.subr.bf16.mxu0 %v1012_v19 }
 0x147   :  { %v688_v4 = vrot.slane %v1136_v50, %v687_v3 }
 0x149   :  { %909 = vmatpush3.bf16.msra.mxu0 %v908_v7 }
 0x217   :  { %v392_v54 = vpop.f32.mrb[8].mxu0 }
 0x218   :  { %v393_v55 = vadd.f32 %v392_v54, %v319_v52  ;;  %v818_v56 = vpop.f32.mrb[9].mxu0 }
 0x219   :  { %v604_v56 = vsub.s32 3, %v1130_v48 }
 0x21a   :  { %v400_v57 = vadd.f32 %v399_v53, %v393_v55 }
 0x21c   :  { %v401_v58 = vmul.f32 %v400_v57, %v400_v57 }
 0x21e   :  { %v403_v59 = vsel %vm402_vm3, %v401_v58, 0.0 }
 0x21f   :  { %404 = vadd.xlane.f32.xlu0 %v403_v59 }
 0x2ac   :  { %v405_v8 = vpop.xlane.xlu0 %404 }
 0x2ad   :  { %v407_v9 = vmul.f32 0.03125, %v405_v8 }
 0x2af   :  { %v408_v10 = vadd.f32 1e-06, %v407_v9 }
 0x2b1   :  { %953 = vrsqrt.f32 %v408_v10 }
 0x2bb   :  { %v954_v13 = vpop.eup %953 }
 0x2bc   :  { %v410_v14 = vmul.f32 %v954_v13, %v400_v57  ;;  %v605_v57 = vrot.slane %v1136_v50, %v604_v56 }
 0x2be   :  { %v1171_v15 = vmul.f32 %v414_v12, %v410_v14 }
 0x2c0   :  { %828 = vmatmul.mubr.msk.f32.vlgmr.msra.gmra.mrb[0].mxu1 %vm47_vm0, %v1171_v15  ;;  %839 = vmatmul.mubr.msk.f32.vlgmr.msra.gmra.mrb[10].mxu0 %vm47_vm0, %v1171_v15 }
 0x2c1   :  { %873 = vmatprep.mubr.msk.f32.mxu1 %vm1013_vm1, %v1014_v23  ;;  %912 = vmatpush3.bf16.msra.mxu1 %v911_v18  ;;  %v589_v23 = vld [vmem:[%s1264_s5 + $0x18] sm:$0xff]  ;;  %s697_s5 = sshll.u32 %s1015_s2, 4  ;;  %s698_s5 = int_to_ptr.vmem [resolvable:$true] %s697_s5 }
 0x2c2   :  { %913 = vmatprep.subr.bf16.mxu1 %v1012_v19  ;;  %v914_v21 = vpack.c.bf16 %v589_v23, %v588_v20  ;;  %s983_s8 = scalar_lea.vmem %s698_s5, 32  ;;  %p988_p9 = scmp.lt.s32.totalorder %s698_s5, %s698_s5 }
 0x2c3   :  { %p984_p8 = scmp.ne.s32.totalorder %s698_s5, %s983_s8  ;;  %p989_p10 = scmp.lt.s32.totalorder %s983_s8, %s983_s8 }
 0x2c5   :  { %915 = vmatpush3.bf16.msra.mxu1 %v914_v21  ;;  %p990_p11 = por %p989_p10, %p988_p9 }
 0x2c6   :  { %916 = vmatprep.subr.bf16.mxu1 %v1012_v19 }
 0x2c7   :  { %p991_p12 = pnand %p990_p11, %p984_p8 }
 0x2c9   :  { %918 = vmatpush3.bf16.msra.mxu1 %v917_v25 }
 0x2ca   :  { %919 = vmatprep.subr.bf16.mxu1 %v1012_v19 }
 0x2cd   :  { %921 = vmatpush3.bf16.msra.mxu1 %v920_v28 }
 0x2ce   :  { %922 = vmatprep.subr.bf16.mxu1 %v1012_v19 }
 0x2d1   :  { %924 = vmatpush3.bf16.msra.mxu1 %v923_v31 }
 0x2d2   :  { %925 = vmatprep.subr.bf16.mxu1 %v1012_v19 }
 0x2d5   :  { %927 = vmatpush3.bf16.msra.mxu1 %v926_v34 }
 0x2d6   :  { %928 = vmatprep.subr.bf16.mxu1 %v1012_v19 }
 0x2d9   :  { %930 = vmatpush3.bf16.msra.mxu1 %v929_v36 }
 0x2da   :  { %931 = vmatprep.subr.bf16.mxu1 %v1012_v19 }
 0x2dd   :  { %933 = vmatpush3.bf16.msra.mxu1 %v932_v40 }
 0x393   :  { %v494_v43 = vpop.f32.mrb[0].mxu1  ;;  %v574_v44 = vpop.f32.mrb[10].mxu0 }
 0x394   :  { %v575_v46 = vadd.f32 %v729_v41, %v574_v44  ;;  %v829_v47 = vpop.f32.mrb[1].mxu1  ;;  %v840_v42 = vpop.f32.mrb[11].mxu0  ;;  %v495_v53 = vadd.f32 %v723_v51, %v494_v43 }
 0x396   :  { %v731_v19 = vmul.f32 -1.442695, %v575_v46 }
 0x398   :  { %955 = vpow2.f32 %v731_v19 }
 0x3a2   :  { %v956_v45 = vpop.eup %955 }
 0x3a3   :  { %v581_v49 = vadd.f32 1.0, %v956_v45 }
 0x3a5   :  { %957 = vrcp.f32 %v581_v49 }
 0x3af   :  { %v958_v52 = vpop.eup %957 }
 0x3b0   :  { %v584_v54 = vmul.f32 %v958_v52, %v575_v46 }
 0x3b2   :  { %v585_v55 = vmul.f32 %v584_v54, %v495_v53 }
 0x3b4   :  { %874 = vmatmul.mubr.f32.vlgmr.msra.gmra.mrb[2].mxu1 %v585_v55 }
 0x487   :  { %v672_v58 = vpop.f32.mrb[2].mxu1 }
 0x488   :  { %v673_v59 = vadd.f32 %v672_v58, %v605_v57  ;;  %v875_v60 = vpop.f32.mrb[3].mxu1 }
 0x48a   :  { %v676_v61 = vadd.f32 %v673_v59, %v1171_v15 }
 0x48c   :  { %v677_v62 = vmul.f32 %v676_v61, %v676_v61 }
 0x48e   :  { %v678_v63 = vsel %vm402_vm3, %v677_v62, 0.0 }
 0x48f   :  { %679 = vadd.xlane.f32.xlu0 %v678_v63 }
 0x51c   :  { %v680_v0 = vpop.xlane.xlu0 %679 }
 0x51d   :  { %v681_v1 = vmul.f32 0.03125, %v680_v0 }
 0x51f   :  { %v682_v2 = vadd.f32 1e-06, %v681_v1 }
 0x521   :  { %959 = vrsqrt.f32 %v682_v2 }
 0x52b   :  { %v960_v5 = vpop.eup %959 }
 0x52c   :  { %v684_v6 = vmul.f32 %v960_v5, %v676_v61 }
 0x52e   :  { %v689_v7 = vmul.f32 %v688_v4, %v684_v6 }
 0x530   :  { %690 = vst.msk [vmem:[#allocation5] sm:$0x3] %vm402_vm3, %v689_v7 }
 0x531   :  { %994 = shalt.err (!%p991_p12)
}
 0x532   :  { %s995_s10 = scalar_lea.hbm %s1265_s6, 32 }
 0x533   :  { %p996_p13 = scmp.ne.s32.totalorder %s1265_s6, %s995_s10  ;;  %p999_p0 = scmp.lt.u32.totalorder %s995_s10, %s1265_s6 }
 0x535   :  { %p1001_p1 = pnand %p999_p0, %p996_p13 }
 0x537   :  { %1004 = shalt.err (!%p1001_p1)
}
 0x538   :  { %700 = dma.vmem_to_hbm [thread:$0]  %s698_s5, 32, %s1265_s6, [#allocation4]  }
 0x539   :  { %1007 = dma.done.wait [#allocation4], 32  }
 0x53a   :  { %1008 = vsyncadd [#allocation4], 4294967264 }
 0x53b   :  { %704 = vsyncpa [#allocation3], 1 }
 0x53c   :  { %705 = vsyncpa [#allocation4], 1 }

</bundles_post_ra>
